<compile_context>
chip_gen: v6e
topology: v6e:2x2x1
jax: 0.10.0
libtpu: 0.0.40
codegen_flags: <defaults>
</compile_context>

<pallas_src>
import jax
import jax.numpy as jnp
from jax.experimental import pallas as pl
from jax.experimental.pallas import tpu as pltpu

IN_FEATURES = 32 * 4 * 4   # 512
HIDDEN = 512
OUT_FEATURES = 8
OUT_PADDED = 128           # lane-dense fc2 matmul operand width (zero-padded cols)


def _round_up(n, m):
    return (n + m - 1) // m * m


def mlp_kernel(x_ref, w1_ref, b1_ref, w2_ref, b2_ref, o_ref):
    # In-kernel f32 -> bf16 cast of the activation tile (VPU, hides under MXU).
    x_bf16 = x_ref[...].astype(jnp.bfloat16)
    # fc1: [TB, 512]bf16 @ [512, 512]bf16 -> f32 accumulate, + bias, ReLU.
    h = jnp.dot(x_bf16, w1_ref[...], preferred_element_type=jnp.float32)
    h = jnp.maximum(h + b1_ref[...], 0.0)
    # TODO(synk): nn.Dropout(0.5) is identity in eval mode; training-mode
    # stochastic masking (pltpu.prng_*) + 1/(1-p) scaling intentionally omitted.
    # fc2: [TB, 512]bf16 @ [512, 128]bf16 (zero-padded cols) -> f32, + bias.
    out = jnp.dot(h.astype(jnp.bfloat16), w2_ref[...],
                  preferred_element_type=jnp.float32)
    out = out + b2_ref[...]
    # Only the first 8 columns are real; store a narrow (TB, 8) result.
    o_ref[...] = out[:, :OUT_FEATURES].astype(o_ref.dtype)


@jax.jit
def mlp_forward(x, w1_bf16, b1, w2p_bf16, b2p):
    """x: [B, 512] f32.  Returns [B, 8] in x.dtype."""
    B = x.shape[0]

    if B < 256:
        # Single tile whose block dims equal the full array dims: always a
        # legal BlockSpec, no batch padding, no dead rows through the MXU.
        TB, Bp = B, B
    else:
        # Pad only to the next multiple of 128, then pick the largest tile
        # from {1024, 512, 256, 128} that divides the padded batch (bounds the
        # f32 `h` intermediate to <= 2 MiB and avoids dead padded rows).
        Bp = _round_up(B, 128)
        TB = next(c for c in (1024, 512, 256, 128) if Bp % c == 0)
        # Keep >= 2 grid steps so both v7x TensorCores get work.
        if Bp // TB < 2 and TB > 128:
            TB //= 2

    xp = x if Bp == B else jnp.pad(x, ((0, Bp - B), (0, 0)))

    out = pl.pallas_call(
        mlp_kernel,
        out_shape=jax.ShapeDtypeStruct((Bp, OUT_FEATURES), jnp.float32),
        grid=(Bp // TB,),
        in_specs=[
            pl.BlockSpec((TB, IN_FEATURES), lambda i: (i, 0)),      # x tile (f32)
            pl.BlockSpec((IN_FEATURES, HIDDEN), lambda i: (0, 0)),  # w1 resident
            pl.BlockSpec((1, HIDDEN), lambda i: (0, 0)),            # b1 resident
            pl.BlockSpec((HIDDEN, OUT_PADDED), lambda i: (0, 0)),   # w2 resident
            pl.BlockSpec((1, OUT_PADDED), lambda i: (0, 0)),        # b2 resident
        ],
        out_specs=pl.BlockSpec((TB, OUT_FEATURES), lambda i: (i, 0)),
        compiler_params=pltpu.CompilerParams(
            dimension_semantics=("parallel",)),
    )(xp, w1_bf16, b1, w2p_bf16, b2p)

    # Padded batch rows (which carry bias values, not zeros) are dropped here.
    out = out if Bp == B else out[:B]
    return out.astype(x.dtype)


def init_params(key):
    """Deterministic synthetic init matching nn.Linear shapes.

    PyTorch stores Linear weights as [out, in]; we store the transpose
    [in, out].  Returns both the f32 reference params and the kernel-ready
    (bf16 weights, fc2 lane-padded) params.
    """
    k1, k2, k3, k4 = jax.random.split(key, 4)
    bound1 = 1.0 / jnp.sqrt(IN_FEATURES)
    bound2 = 1.0 / jnp.sqrt(HIDDEN)
    w1 = jax.random.uniform(k1, (IN_FEATURES, HIDDEN), jnp.float32,
                            -bound1, bound1)
    b1 = jax.random.uniform(k2, (1, HIDDEN), jnp.float32, -bound1, bound1)
    w2 = jax.random.uniform(k3, (HIDDEN, OUT_FEATURES), jnp.float32,
                            -bound2, bound2)
    b2 = jax.random.uniform(k4, (1, OUT_FEATURES), jnp.float32,
                            -bound2, bound2)

    # Kernel-ready params: bf16 weights, fc2 operand zero-padded to 128 lanes.
    w1_bf16 = w1.astype(jnp.bfloat16)
    w2p = jnp.zeros((HIDDEN, OUT_PADDED), jnp.float32).at[:, :OUT_FEATURES].set(w2)
    w2p_bf16 = w2p.astype(jnp.bfloat16)
    b2p = jnp.zeros((1, OUT_PADDED), jnp.float32).at[:, :OUT_FEATURES].set(b2)

    return (w1, b1, w2, b2), (w1_bf16, b1, w2p_bf16, b2p)


if __name__ == "__main__":
    key = jax.random.PRNGKey(0)
    kx, kp = jax.random.split(key)

    batch = 8
    x = jax.random.normal(kx, (batch, IN_FEATURES), dtype=jnp.float32)
    (w1, b1, w2, b2), kernel_params = init_params(kp)

    out = mlp_forward(x, *kernel_params)
    out = jax.block_until_ready(out)
    assert out.shape == (batch, OUT_FEATURES)

    # Reference 1: matched precision (bf16 operands, f32 accumulation) -> tight.
    h_ref = jnp.maximum(
        jnp.dot(x.astype(jnp.bfloat16), w1.astype(jnp.bfloat16),
                preferred_element_type=jnp.float32) + b1, 0.0)
    ref_bf16 = jnp.dot(h_ref.astype(jnp.bfloat16), w2.astype(jnp.bfloat16),
                       preferred_element_type=jnp.float32) + b2
    assert jnp.allclose(out, ref_bf16, atol=1e-3, rtol=1e-3)

    # Reference 2: pure f32 semantics of the module (eval dropout = identity),
    # loose tolerance to cover the bf16 operand cast.
    ref_f32 = jnp.maximum(x @ w1 + b1, 0.0) @ w2 + b2
    assert jnp.allclose(out, ref_f32, atol=3e-2, rtol=3e-2)

    print("KERNEL_OK")
</pallas_src>

<mosaic_0001>
module attributes {stable_mosaic.version = 11 : i64} {
  func.func @mlp_kernel(%arg0: i32, %arg1: memref<8x512xf32, #tpu.memory_space<vmem>>, %arg2: memref<512x512xbf16, #tpu.memory_space<vmem>>, %arg3: memref<1x512xf32, #tpu.memory_space<vmem>>, %arg4: memref<512x128xbf16, #tpu.memory_space<vmem>>, %arg5: memref<1x128xf32, #tpu.memory_space<vmem>>, %arg6: memref<8x8xf32, #tpu.memory_space<vmem>>) attributes {dimension_semantics = [#tpu.dimension_semantics<parallel>], iteration_bounds = array<i64: 1>, scalar_prefetch = 0 : i64, scratch_operands = 0 : i64, tpu.core_type = #tpu.core_type<tc>, window_params = [{transform_indices = @transform_0, window_bounds = array<i64: 8, 512>}, {pipeline_mode = #tpu.pipeline_mode<synchronous>, transform_indices = @transform_1, window_bounds = array<i64: 512, 512>}, {pipeline_mode = #tpu.pipeline_mode<synchronous>, transform_indices = @transform_2, window_bounds = array<i64: 1, 512>}, {pipeline_mode = #tpu.pipeline_mode<synchronous>, transform_indices = @transform_3, window_bounds = array<i64: 512, 128>}, {pipeline_mode = #tpu.pipeline_mode<synchronous>, transform_indices = @transform_4, window_bounds = array<i64: 1, 128>}, {transform_indices = @transform_5, window_bounds = array<i64: 8, 8>}]} {
    %c0 = arith.constant 0 : index
    %c0_0 = arith.constant 0 : index
    %0 = vector.load %arg1[%c0, %c0_0] : memref<8x512xf32, #tpu.memory_space<vmem>>, vector<8x512xf32>
    %1 = arith.truncf %0 : vector<8x512xf32> to vector<8x512xbf16>
    %c0_1 = arith.constant 0 : index
    %c0_2 = arith.constant 0 : index
    %2 = vector.load %arg2[%c0_1, %c0_2] : memref<512x512xbf16, #tpu.memory_space<vmem>>, vector<512x512xbf16>
    %cst = arith.constant dense<0.000000e+00> : vector<8x512xf32>
    %3 = tpu.matmul %1, %2, %cst {dimension_numbers = #tpu.dot_dimension_numbers<[1], [0], [0], [1], [0, 0, 1, 1], [], []>} : vector<8x512xbf16>, vector<512x512xbf16>, vector<8x512xf32> -> vector<8x512xf32>
    %c0_3 = arith.constant 0 : index
    %c0_4 = arith.constant 0 : index
    %4 = vector.load %arg3[%c0_3, %c0_4] : memref<1x512xf32, #tpu.memory_space<vmem>>, vector<1x512xf32>
    %5 = vector.broadcast %4 : vector<1x512xf32> to vector<8x512xf32>
    %6 = arith.addf %3, %5 : vector<8x512xf32>
    %cst_5 = arith.constant 0.000000e+00 : f32
    %7 = vector.broadcast %cst_5 : f32 to vector<8x512xf32>
    %8 = arith.maximumf %6, %7 : vector<8x512xf32>
    %9 = arith.truncf %8 : vector<8x512xf32> to vector<8x512xbf16>
    %c0_6 = arith.constant 0 : index
    %c0_7 = arith.constant 0 : index
    %10 = vector.load %arg4[%c0_6, %c0_7] : memref<512x128xbf16, #tpu.memory_space<vmem>>, vector<512x128xbf16>
    %cst_8 = arith.constant dense<0.000000e+00> : vector<8x128xf32>
    %11 = tpu.matmul %9, %10, %cst_8 {dimension_numbers = #tpu.dot_dimension_numbers<[1], [0], [0], [1], [0, 0, 1, 1], [], []>} : vector<8x512xbf16>, vector<512x128xbf16>, vector<8x128xf32> -> vector<8x128xf32>
    %c0_9 = arith.constant 0 : index
    %c0_10 = arith.constant 0 : index
    %12 = vector.load %arg5[%c0_9, %c0_10] : memref<1x128xf32, #tpu.memory_space<vmem>>, vector<1x128xf32>
    %13 = vector.broadcast %12 : vector<1x128xf32> to vector<8x128xf32>
    %14 = arith.addf %11, %13 : vector<8x128xf32>
    %15 = vector.extract_strided_slice %14 {offsets = [0, 0], sizes = [8, 8], strides = [1, 1]} : vector<8x128xf32> to vector<8x8xf32>
    %c0_11 = arith.constant 0 : index
    %c0_12 = arith.constant 0 : index
    %16 = vector.load %arg6[%c0_11, %c0_12] : memref<8x8xf32, #tpu.memory_space<vmem>>, vector<8x8xf32>
    tpu.vector_store %arg6[%c0_11, %c0_12], %15 {strides = array<i32>} : memref<8x8xf32, #tpu.memory_space<vmem>>, vector<8x8xf32>,
    return
  }
  func.func @transform_0(%arg0: i32) -> (i32, i32) {
    %c0_i32 = arith.constant 0 : i32
    %c0_i32_0 = arith.constant 0 : i32
    return %arg0, %c0_i32 : i32, i32
  }
  func.func @transform_1(%arg0: i32) -> (i32, i32) {
    %c0_i32 = arith.constant 0 : i32
    %c0_i32_0 = arith.constant 0 : i32
    %c0_i32_1 = arith.constant 0 : i32
    return %c0_i32, %c0_i32_0 : i32, i32
  }
  func.func @transform_2(%arg0: i32) -> (i32, i32) {
    %c0_i32 = arith.constant 0 : i32
    %c0_i32_0 = arith.constant 0 : i32
    %c0_i32_1 = arith.constant 0 : i32
    return %c0_i32, %c0_i32_0 : i32, i32
  }
  func.func @transform_3(%arg0: i32) -> (i32, i32) {
    %c0_i32 = arith.constant 0 : i32
    %c0_i32_0 = arith.constant 0 : i32
    %c0_i32_1 = arith.constant 0 : i32
    return %c0_i32, %c0_i32_0 : i32, i32
  }
  func.func @transform_4(%arg0: i32) -> (i32, i32) {
    %c0_i32 = arith.constant 0 : i32
    %c0_i32_0 = arith.constant 0 : i32
    %c0_i32_1 = arith.constant 0 : i32
    return %c0_i32, %c0_i32_0 : i32, i32
  }
  func.func @transform_5(%arg0: i32) -> (i32, i32) {
    %c0_i32 = arith.constant 0 : i32
    %c0_i32_0 = arith.constant 0 : i32
    return %arg0, %c0_i32 : i32, i32
  }
}

</mosaic_0001>

<bundles_post_ra>
// kernel: mlp_forward.1
= control target key start
LH: loop header
LB: loop body
LE: loop exit
PB: predicated region body
PF: predicated region fallthrough
CT: control target
= control target key end

     0   :  { %10 = vsyncpa [#allocation3], 0  ;;  %s2020_s0 = inlined_call_operand.hbm [shape: f32[8,512], index: 0, kind: input, shape index: {}]   ;;  %s2021_s1 = inlined_call_operand.hbm [shape: bf16[512,512], index: 1, kind: input, shape index: {}]   ;;  %s2022_s2 = inlined_call_operand.hbm [shape: f32[1,512], index: 2, kind: input, shape index: {}]   ;;  %s2023_s3 = inlined_call_operand.hbm [shape: bf16[512,128], index: 3, kind: input, shape index: {}]   ;;  %s2024_s4 = inlined_call_operand.vmem [shape: f32[1,128], index: 4, kind: input, shape index: {}]   ;;  %s2025_s5 = inlined_call_operand.hbm [shape: f32[8,8], index: 5, kind: output, shape index: {}]  }
   0x1   :  { %11 = vsyncpa [#allocation6], 0 }
   0x2   :  { %12 = vsyncpa [#allocation9], 0 }
   0x3   :  { %13 = vsyncpa [#allocation4], 0  ;;  %s1951_s18 = smov [#allocation5]  }
   0x4   :  { %s29_s19 = sshll.u32 %s1951_s18, 4  ;;  %s30_s19 = int_to_ptr.vmem [resolvable:$true] %s29_s19 }
   0x5   :  { %s1851_s20 = scalar_lea.vmem %s30_s19, 16384  ;;  %p1856_p1 = scmp.lt.s32.totalorder %s30_s19, %s30_s19 }
   0x6   :  { %p1852_p0 = scmp.ne.s32.totalorder %s30_s19, %s1851_s20  ;;  %p1857_p2 = scmp.lt.s32.totalorder %s1851_s20, %s1851_s20 }
   0x8   :  { %p1858_p3 = por %p1857_p2, %p1856_p1 }
   0xa   :  { %p1859_p4 = pnand %p1858_p3, %p1852_p0 }
   0xc   :  { %1862 = shalt.err (!%p1859_p4)
}
   0xd   :  { %s1952_s21 = smov 256   ;;  %s1953_s22 = smov 16  }
   0xe   :  { %35 = dma.hbm_to_vmem [thread:$0]  %s2021_s1, 16384, %s30_s19, [#allocation6], %s1952_s21, %s1952_s21, %s1953_s22  }
   0xf   :  { %s1954_s25 = smov [#allocation2]   ;;  %s1955_s27 = smov [#allocation7]  }
  0x10   :  { %s20_s26 = sshll.u32 %s1954_s25, 4  ;;  %s42_s28 = sshll.u32 %s1955_s27, 4  ;;  %s21_s26 = int_to_ptr.vmem [resolvable:$true] %s20_s26  ;;  %s43_s28 = int_to_ptr.vmem [resolvable:$true] %s42_s28 }
  0x11   :  { %s1871_s29 = scalar_lea.vmem %s21_s26, 512  ;;  %p1876_p6 = scmp.lt.s32.totalorder %s21_s26, %s21_s26 }
  0x12   :  { %p1872_p5 = scmp.ne.s32.totalorder %s21_s26, %s1871_s29  ;;  %p1877_p7 = scmp.lt.s32.totalorder %s1871_s29, %s1871_s29 }
  0x14   :  { %p1878_p8 = por %p1877_p7, %p1876_p6 }
  0x16   :  { %p1879_p9 = pnand %p1878_p8, %p1872_p5 }
  0x18   :  { %1882 = shalt.err (!%p1879_p9)
}
  0x19   :  { %23 = dma.hbm_to_vmem [thread:$0]  %s2020_s0, 512, %s21_s26, [#allocation3]  }
  0x1a   :  { %s1891_s7 = scalar_lea.vmem %s43_s28, 64  ;;  %p1896_p11 = scmp.lt.s32.totalorder %s43_s28, %s43_s28 }
  0x1b   :  { %p1892_p10 = scmp.ne.s32.totalorder %s43_s28, %s1891_s7  ;;  %p1897_p12 = scmp.lt.s32.totalorder %s1891_s7, %s1891_s7 }
  0x1d   :  { %p1898_p13 = por %p1897_p12, %p1896_p11 }
  0x1f   :  { %p1899_p0 = pnand %p1898_p13, %p1892_p10 }
  0x21   :  { %1902 = shalt.err (!%p1899_p0)
}
  0x22   :  { %45 = dma.hbm_to_vmem [thread:$0]  %s2022_s2, 64, %s43_s28, [#allocation6]  }
  0x23   :  { %s1956_s9 = smov [#allocation8]  }
  0x24   :  { %s51_s10 = sshll.u32 %s1956_s9, 4  ;;  %s52_s10 = int_to_ptr.vmem [resolvable:$true] %s51_s10 }
  0x25   :  { %s1911_s11 = scalar_lea.vmem %s52_s10, 4096  ;;  %p1916_p2 = scmp.lt.s32.totalorder %s52_s10, %s52_s10 }
  0x26   :  { %p1912_p1 = scmp.ne.s32.totalorder %s52_s10, %s1911_s11  ;;  %p1917_p3 = scmp.lt.s32.totalorder %s1911_s11, %s1911_s11 }
  0x28   :  { %p1918_p4 = por %p1917_p3, %p1916_p2 }
  0x2a   :  { %p1919_p5 = pnand %p1918_p4, %p1912_p1 }
  0x2c   :  { %1922 = shalt.err (!%p1919_p5)
}
  0x2d   :  { %s1957_s0 = smov 64   ;;  %s1958_s12 = smov 4  }
  0x2e   :  { %57 = dma.hbm_to_vmem [thread:$0]  %s2023_s3, 4096, %s52_s10, [#allocation9], %s1957_s0, %s1957_s0, %s1958_s12  }
  0x2f   :  { %1943 = dma.done.wait [#allocation3], 512  }
  0x30   :  { %1944 = vsyncadd [#allocation3], 4294966784 }
  0x31   :  { %1945 = dma.done.wait [#allocation6], 16448  }
  0x32   :  { %1946 = vsyncadd [#allocation6], 4294950848 }
  0x33   :  { %1947 = dma.done.wait [#allocation9], 4096  }
  0x34   :  { %1948 = vsyncadd [#allocation9], 4294963200  ;;  %v1619_v0 = vld [vmem:[#allocation5 + $0xe4] ss:$16 sps:$4 sm:$0xff]   ;;  %v1623_v2 = vld [vmem:[#allocation5 + $0xe0] ss:$16 sps:$4 sm:$0xff]  }
  0x35   :  { %v1621_v1 = vld [vmem:[#allocation5 + $0x2e4] ss:$16 sps:$4 sm:$0xff]   ;;  %871 = vmatprep.subr.bf16.mxu0 %v1619_v0  ;;  %v1624_v3 = vld [vmem:[#allocation5 + $0x2e0] ss:$16 sps:$4 sm:$0xff]   ;;  %v74_v46 = vld [vmem:[#allocation2 + $0x8] sm:$0xff]  ;;  %s1959_s15 = smov [#allocation10]  }
  0x36   :  { %912 = vmatprep.subr.bf16.mxu1 %v1621_v1  ;;  %v1625_v4 = vld [vmem:[#allocation5 + $0xc4] ss:$16 sps:$4 sm:$0xff]   ;;  %872 = vmatpush1.bf16.msra.mxu0 %v1623_v2  ;;  %v1629_v6 = vld [vmem:[#allocation5 + $0xc0] ss:$16 sps:$4 sm:$0xff]   ;;  %v2002_v49 = vpack.c.bf16 %v74_v46, %v74_v46  ;;  %v76_v50 = vld [vmem:[#allocation2 + $0x18] sm:$0xff]  ;;  %s1394_s16 = sshll.u32 %s1959_s15, 4  ;;  %s1395_s16 = int_to_ptr.vmem [resolvable:$true] %s1394_s16 }
  0x37   :  { %913 = vmatpush1.bf16.msra.mxu1 %v1624_v3  ;;  %v1627_v5 = vld [vmem:[#allocation5 + $0x2c4] ss:$16 sps:$4 sm:$0xff]   ;;  %873 = vmatprep.subr.bf16.mxu0 %v1625_v4  ;;  %v1630_v7 = vld [vmem:[#allocation5 + $0x2c0] ss:$16 sps:$4 sm:$0xff]   ;;  %v80_v52 = vpack.c.bf16 %v76_v50, %v76_v50  ;;  %v1769_v46 = vld [vmem:[#allocation5 + $0x1c8] ss:$16 sps:$4 sm:$0xff]   ;;  %p1928_p7 = scmp.lt.s32.totalorder %s1395_s16, %s1395_s16 }
  0x38   :  { %914 = vmatprep.subr.bf16.mxu1 %v1627_v5  ;;  %v1631_v8 = vld [vmem:[#allocation5 + $0xa4] ss:$16 sps:$4 sm:$0xff]   ;;  %v1635_v10 = vld [vmem:[#allocation5 + $0xa0] ss:$16 sps:$4 sm:$0xff]   ;;  %903 = vmatprep.mubr.bf16.mxu0 %v2002_v49  ;;  %v1775_v50 = vld [vmem:[#allocation5 + $0x1a8] ss:$16 sps:$4 sm:$0xff]  }
  0x39   :  { %v1633_v9 = vld [vmem:[#allocation5 + $0x2a4] ss:$16 sps:$4 sm:$0xff]   ;;  %v1636_v11 = vld [vmem:[#allocation5 + $0x2a0] ss:$16 sps:$4 sm:$0xff]   ;;  %944 = vmatprep.mubr.bf16.mxu1 %v80_v52  ;;  %vm1386_vm0 = vcmask 64512   ;;  %s1923_s17 = scalar_lea.vmem %s1395_s16, 128 }
  0x3a   :  { %874 = vmatpush1.bf16.msra.mxu0 %v1629_v6  ;;  %v1637_v12 = vld [vmem:[#allocation5 + $0x84] ss:$16 sps:$4 sm:$0xff]   ;;  %v1641_v14 = vld [vmem:[#allocation5 + $0x80] ss:$16 sps:$4 sm:$0xff]   ;;  %v1717_v6 = vld [vmem:[#allocation5 + $0xec] ss:$16 sps:$4 sm:$0xff]   ;;  %p1924_p6 = scmp.ne.s32.totalorder %s1395_s16, %s1923_s17  ;;  %p1929_p8 = scmp.lt.s32.totalorder %s1923_s17, %s1923_s17 }
  0x3b   :  { %915 = vmatpush1.bf16.msra.mxu1 %v1630_v7  ;;  %875 = vmatprep.subr.bf16.mxu0 %v1631_v8  ;;  %v1639_v13 = vld [vmem:[#allocation5 + $0x284] ss:$16 sps:$4 sm:$0xff]   ;;  %v1642_v15 = vld [vmem:[#allocation5 + $0x280] ss:$16 sps:$4 sm:$0xff]   ;;  %v1720_v7 = vld [vmem:[#allocation5 + $0x2ec] ss:$16 sps:$4 sm:$0xff]  }
  0x3c   :  { %916 = vmatprep.subr.bf16.mxu1 %v1633_v9  ;;  %v1643_v16 = vld [vmem:[#allocation5 + $0x64] ss:$16 sps:$4 sm:$0xff]   ;;  %v1647_v18 = vld [vmem:[#allocation5 + $0x60] ss:$16 sps:$4 sm:$0xff]   ;;  %p1930_p9 = por %p1929_p8, %p1928_p7 }
  0x3d   :  { %v1645_v17 = vld [vmem:[#allocation5 + $0x264] ss:$16 sps:$4 sm:$0xff]   ;;  %v1648_v19 = vld [vmem:[#allocation5 + $0x260] ss:$16 sps:$4 sm:$0xff]  }
  0x3e   :  { %876 = vmatpush1.bf16.msra.mxu0 %v1635_v10  ;;  %v1649_v20 = vld [vmem:[#allocation5 + $0x44] ss:$16 sps:$4 sm:$0xff]   ;;  %v1653_v22 = vld [vmem:[#allocation5 + $0x40] ss:$16 sps:$4 sm:$0xff]   ;;  %v1715_v10 = vld [vmem:[#allocation5 + $0xe8] ss:$16 sps:$4 sm:$0xff]   ;;  %p1931_p10 = pnand %p1930_p9, %p1924_p6 }
  0x3f   :  { %917 = vmatpush1.bf16.msra.mxu1 %v1636_v11  ;;  %877 = vmatprep.subr.bf16.mxu0 %v1637_v12  ;;  %v1651_v21 = vld [vmem:[#allocation5 + $0x244] ss:$16 sps:$4 sm:$0xff]   ;;  %v1654_v23 = vld [vmem:[#allocation5 + $0x240] ss:$16 sps:$4 sm:$0xff]   ;;  %v1718_v11 = vld [vmem:[#allocation5 + $0x2e8] ss:$16 sps:$4 sm:$0xff]  }
  0x40   :  { %918 = vmatprep.subr.bf16.mxu1 %v1639_v13  ;;  %v1655_v24 = vld [vmem:[#allocation5 + $0x24] ss:$16 sps:$4 sm:$0xff]   ;;  %v1659_v26 = vld [vmem:[#allocation5 + $0x20] ss:$16 sps:$4 sm:$0xff]   ;;  %v1723_v12 = vld [vmem:[#allocation5 + $0xcc] ss:$16 sps:$4 sm:$0xff]  }
  0x41   :  { %v1657_v25 = vld [vmem:[#allocation5 + $0x224] ss:$16 sps:$4 sm:$0xff]   ;;  %v1660_v27 = vld [vmem:[#allocation5 + $0x220] ss:$16 sps:$4 sm:$0xff]   ;;  %v1726_v13 = vld [vmem:[#allocation5 + $0x2cc] ss:$16 sps:$4 sm:$0xff]  }
  0x42   :  { %878 = vmatpush1.bf16.msra.mxu0 %v1641_v14  ;;  %v1661_v28 = vld [vmem:[#allocation5 + $0x4] ss:$16 sps:$4 sm:$0xff]   ;;  %v1665_v30 = vld [vmem:[#allocation5] ss:$16 sps:$4 sm:$0xff]   ;;  %v1721_v14 = vld [vmem:[#allocation5 + $0xc8] ss:$16 sps:$4 sm:$0xff]  }
  0x43   :  { %919 = vmatpush1.bf16.msra.mxu1 %v1642_v15  ;;  %879 = vmatprep.subr.bf16.mxu0 %v1643_v16  ;;  %v1663_v29 = vld [vmem:[#allocation5 + $0x204] ss:$16 sps:$4 sm:$0xff]   ;;  %v1666_v31 = vld [vmem:[#allocation5 + $0x200] ss:$16 sps:$4 sm:$0xff]   ;;  %v1724_v15 = vld [vmem:[#allocation5 + $0x2c8] ss:$16 sps:$4 sm:$0xff]  }
  0x44   :  { %920 = vmatprep.subr.bf16.mxu1 %v1645_v17  ;;  %v1667_v32 = vld [vmem:[#allocation5 + $0x1e4] ss:$16 sps:$4 sm:$0xff]   ;;  %v1671_v34 = vld [vmem:[#allocation5 + $0x1e0] ss:$16 sps:$4 sm:$0xff]   ;;  %v1729_v16 = vld [vmem:[#allocation5 + $0xac] ss:$16 sps:$4 sm:$0xff]  }
  0x45   :  { %v1669_v33 = vld [vmem:[#allocation5 + $0x3e4] ss:$16 sps:$4 sm:$0xff]   ;;  %v1672_v35 = vld [vmem:[#allocation5 + $0x3e0] ss:$16 sps:$4 sm:$0xff]   ;;  %v1732_v17 = vld [vmem:[#allocation5 + $0x2ac] ss:$16 sps:$4 sm:$0xff]  }
  0x46   :  { %880 = vmatpush1.bf16.msra.mxu0 %v1647_v18  ;;  %v1673_v36 = vld [vmem:[#allocation5 + $0x1c4] ss:$16 sps:$4 sm:$0xff]   ;;  %v1677_v38 = vld [vmem:[#allocation5 + $0x1c0] ss:$16 sps:$4 sm:$0xff]   ;;  %v1727_v18 = vld [vmem:[#allocation5 + $0xa8] ss:$16 sps:$4 sm:$0xff]  }
  0x47   :  { %921 = vmatpush1.bf16.msra.mxu1 %v1648_v19  ;;  %881 = vmatprep.subr.bf16.mxu0 %v1649_v20  ;;  %v1675_v37 = vld [vmem:[#allocation5 + $0x3c4] ss:$16 sps:$4 sm:$0xff]   ;;  %v1678_v39 = vld [vmem:[#allocation5 + $0x3c0] ss:$16 sps:$4 sm:$0xff]   ;;  %v1730_v19 = vld [vmem:[#allocation5 + $0x2a8] ss:$16 sps:$4 sm:$0xff]  }
  0x48   :  { %922 = vmatprep.subr.bf16.mxu1 %v1651_v21  ;;  %v1679_v40 = vld [vmem:[#allocation5 + $0x1a4] ss:$16 sps:$4 sm:$0xff]   ;;  %v1683_v42 = vld [vmem:[#allocation5 + $0x1a0] ss:$16 sps:$4 sm:$0xff]   ;;  %v1735_v20 = vld [vmem:[#allocation5 + $0x8c] ss:$16 sps:$4 sm:$0xff]  }
  0x49   :  { %v1681_v41 = vld [vmem:[#allocation5 + $0x3a4] ss:$16 sps:$4 sm:$0xff]   ;;  %v1684_v43 = vld [vmem:[#allocation5 + $0x3a0] ss:$16 sps:$4 sm:$0xff]   ;;  %v1738_v21 = vld [vmem:[#allocation5 + $0x28c] ss:$16 sps:$4 sm:$0xff]  }
  0x4a   :  { %882 = vmatpush1.bf16.msra.mxu0 %v1653_v22  ;;  %v1685_v44 = vld [vmem:[#allocation5 + $0x184] ss:$16 sps:$4 sm:$0xff]   ;;  %v1689_v47 = vld [vmem:[#allocation5 + $0x180] ss:$16 sps:$4 sm:$0xff]   ;;  %v1733_v22 = vld [vmem:[#allocation5 + $0x88] ss:$16 sps:$4 sm:$0xff]  }
  0x4b   :  { %923 = vmatpush1.bf16.msra.mxu1 %v1654_v23  ;;  %883 = vmatprep.subr.bf16.mxu0 %v1655_v24  ;;  %v1687_v45 = vld [vmem:[#allocation5 + $0x384] ss:$16 sps:$4 sm:$0xff]   ;;  %v1690_v48 = vld [vmem:[#allocation5 + $0x380] ss:$16 sps:$4 sm:$0xff]   ;;  %v1736_v23 = vld [vmem:[#allocation5 + $0x288] ss:$16 sps:$4 sm:$0xff]  }
  0x4c   :  { %924 = vmatprep.subr.bf16.mxu1 %v1657_v25  ;;  %v1691_v51 = vld [vmem:[#allocation5 + $0x164] ss:$16 sps:$4 sm:$0xff]   ;;  %v1695_v54 = vld [vmem:[#allocation5 + $0x160] ss:$16 sps:$4 sm:$0xff]   ;;  %v1741_v24 = vld [vmem:[#allocation5 + $0x6c] ss:$16 sps:$4 sm:$0xff]  }
  0x4d   :  { %v1693_v53 = vld [vmem:[#allocation5 + $0x364] ss:$16 sps:$4 sm:$0xff]   ;;  %v1696_v55 = vld [vmem:[#allocation5 + $0x360] ss:$16 sps:$4 sm:$0xff]   ;;  %v1744_v25 = vld [vmem:[#allocation5 + $0x26c] ss:$16 sps:$4 sm:$0xff]  }
  0x4e   :  { %884 = vmatpush1.bf16.msra.mxu0 %v1659_v26  ;;  %v1697_v56 = vld [vmem:[#allocation5 + $0x144] ss:$16 sps:$4 sm:$0xff]   ;;  %v1701_v58 = vld [vmem:[#allocation5 + $0x140] ss:$16 sps:$4 sm:$0xff]   ;;  %v1739_v26 = vld [vmem:[#allocation5 + $0x68] ss:$16 sps:$4 sm:$0xff]  }
  0x4f   :  { %925 = vmatpush1.bf16.msra.mxu1 %v1660_v27  ;;  %885 = vmatprep.subr.bf16.mxu0 %v1661_v28  ;;  %v1699_v57 = vld [vmem:[#allocation5 + $0x344] ss:$16 sps:$4 sm:$0xff]   ;;  %v1702_v59 = vld [vmem:[#allocation5 + $0x340] ss:$16 sps:$4 sm:$0xff]   ;;  %v1742_v27 = vld [vmem:[#allocation5 + $0x268] ss:$16 sps:$4 sm:$0xff]  }
  0x50   :  { %926 = vmatprep.subr.bf16.mxu1 %v1663_v29  ;;  %v1703_v60 = vld [vmem:[#allocation5 + $0x124] ss:$16 sps:$4 sm:$0xff]   ;;  %v1707_v62 = vld [vmem:[#allocation5 + $0x120] ss:$16 sps:$4 sm:$0xff]   ;;  %v1747_v28 = vld [vmem:[#allocation5 + $0x4c] ss:$16 sps:$4 sm:$0xff]  }
  0x51   :  { %v1705_v61 = vld [vmem:[#allocation5 + $0x324] ss:$16 sps:$4 sm:$0xff]   ;;  %v1708_v63 = vld [vmem:[#allocation5 + $0x320] ss:$16 sps:$4 sm:$0xff]   ;;  %v1750_v29 = vld [vmem:[#allocation5 + $0x24c] ss:$16 sps:$4 sm:$0xff]  }
  0x52   :  { %886 = vmatpush1.bf16.msra.mxu0 %v1665_v30  ;;  %v1709_v0 = vld [vmem:[#allocation5 + $0x104] ss:$16 sps:$4 sm:$0xff]   ;;  %v1713_v2 = vld [vmem:[#allocation5 + $0x100] ss:$16 sps:$4 sm:$0xff]   ;;  %v1745_v30 = vld [vmem:[#allocation5 + $0x48] ss:$16 sps:$4 sm:$0xff]  }
  0x53   :  { %927 = vmatpush1.bf16.msra.mxu1 %v1666_v31  ;;  %887 = vmatprep.subr.bf16.mxu0 %v1667_v32  ;;  %v1711_v1 = vld [vmem:[#allocation5 + $0x304] ss:$16 sps:$4 sm:$0xff]   ;;  %v1714_v3 = vld [vmem:[#allocation5 + $0x300] ss:$16 sps:$4 sm:$0xff]   ;;  %v1748_v31 = vld [vmem:[#allocation5 + $0x248] ss:$16 sps:$4 sm:$0xff]  }
  0x54   :  { %928 = vmatprep.subr.bf16.mxu1 %v1669_v33  ;;  %v73_v4 = vld [vmem:[#allocation2] sm:$0xff]  ;;  %v75_v5 = vld [vmem:[#allocation2 + $0x10] sm:$0xff]  ;;  %v1753_v32 = vld [vmem:[#allocation5 + $0x2c] ss:$16 sps:$4 sm:$0xff]  }
  0x55   :  { %v2005_v8 = vpack.c.bf16 %v73_v4, %v73_v4  ;;  %v2007_v9 = vpack.c.bf16 %v75_v5, %v75_v5  ;;  %v1756_v33 = vld [vmem:[#allocation5 + $0x22c] ss:$16 sps:$4 sm:$0xff]  }
  0x56   :  { %888 = vmatpush2.bf16.msra.mxu0 %v1671_v34  ;;  %v1751_v34 = vld [vmem:[#allocation5 + $0x28] ss:$16 sps:$4 sm:$0xff]   ;;  %v1807_v4 = vld [vmem:[#allocation5 + $0x10c] ss:$16 sps:$4 sm:$0xff]  }
  0x57   :  { %929 = vmatpush2.bf16.msra.mxu1 %v1672_v35  ;;  %889 = vmatprep.subr.bf16.mxu0 %v1673_v36  ;;  %v1754_v35 = vld [vmem:[#allocation5 + $0x228] ss:$16 sps:$4 sm:$0xff]   ;;  %v1759_v36 = vld [vmem:[#allocation5 + $0xc] ss:$16 sps:$4 sm:$0xff]  }
  0x58   :  { %930 = vmatprep.subr.bf16.mxu1 %v1675_v37  ;;  %v1762_v37 = vld [vmem:[#allocation5 + $0x20c] ss:$16 sps:$4 sm:$0xff]  }
  0x59   :  { %v1810_v5 = vld [vmem:[#allocation5 + $0x30c] ss:$16 sps:$4 sm:$0xff]  }
  0x5a   :  { %890 = vmatpush2.bf16.msra.mxu0 %v1677_v38  ;;  %v1757_v38 = vld [vmem:[#allocation5 + $0x8] ss:$16 sps:$4 sm:$0xff]  }
  0x5b   :  { %931 = vmatpush2.bf16.msra.mxu1 %v1678_v39  ;;  %891 = vmatprep.subr.bf16.mxu0 %v1679_v40  ;;  %v1760_v39 = vld [vmem:[#allocation5 + $0x208] ss:$16 sps:$4 sm:$0xff]   ;;  %v1765_v40 = vld [vmem:[#allocation5 + $0x1ec] ss:$16 sps:$4 sm:$0xff]  }
  0x5c   :  { %932 = vmatprep.subr.bf16.mxu1 %v1681_v41  ;;  %v1768_v41 = vld [vmem:[#allocation5 + $0x3ec] ss:$16 sps:$4 sm:$0xff]  }
  0x5e   :  { %892 = vmatpush2.bf16.msra.mxu0 %v1683_v42  ;;  %v1763_v42 = vld [vmem:[#allocation5 + $0x1e8] ss:$16 sps:$4 sm:$0xff]  }
  0x5f   :  { %933 = vmatpush2.bf16.msra.mxu1 %v1684_v43  ;;  %893 = vmatprep.subr.bf16.mxu0 %v1685_v44  ;;  %v1766_v43 = vld [vmem:[#allocation5 + $0x3e8] ss:$16 sps:$4 sm:$0xff]   ;;  %v1771_v44 = vld [vmem:[#allocation5 + $0x1cc] ss:$16 sps:$4 sm:$0xff]  }
  0x60   :  { %934 = vmatprep.subr.bf16.mxu1 %v1687_v45  ;;  %v1774_v45 = vld [vmem:[#allocation5 + $0x3cc] ss:$16 sps:$4 sm:$0xff]  }
  0x62   :  { %894 = vmatpush2.bf16.msra.mxu0 %v1689_v47  ;;  %v1772_v47 = vld [vmem:[#allocation5 + $0x3c8] ss:$16 sps:$4 sm:$0xff]  }
  0x63   :  { %935 = vmatpush2.bf16.msra.mxu1 %v1690_v48  ;;  %895 = vmatprep.subr.bf16.mxu0 %v1691_v51  ;;  %v1777_v48 = vld [vmem:[#allocation5 + $0x1ac] ss:$16 sps:$4 sm:$0xff]   ;;  %v1778_v51 = vld [vmem:[#allocation5 + $0x3a8] ss:$16 sps:$4 sm:$0xff]  }
  0x64   :  { %936 = vmatprep.subr.bf16.mxu1 %v1693_v53  ;;  %v1786_v53 = vld [vmem:[#allocation5 + $0x38c] ss:$16 sps:$4 sm:$0xff]  }
  0x66   :  { %896 = vmatpush2.bf16.msra.mxu0 %v1695_v54  ;;  %v1781_v54 = vld [vmem:[#allocation5 + $0x188] ss:$16 sps:$4 sm:$0xff]  }
  0x67   :  { %937 = vmatpush2.bf16.msra.mxu1 %v1696_v55  ;;  %897 = vmatprep.subr.bf16.mxu0 %v1697_v56  ;;  %v1784_v55 = vld [vmem:[#allocation5 + $0x388] ss:$16 sps:$4 sm:$0xff]   ;;  %v1789_v56 = vld [vmem:[#allocation5 + $0x16c] ss:$16 sps:$4 sm:$0xff]  }
  0x68   :  { %938 = vmatprep.subr.bf16.mxu1 %v1699_v57  ;;  %v1792_v57 = vld [vmem:[#allocation5 + $0x36c] ss:$16 sps:$4 sm:$0xff]  }
  0x6a   :  { %898 = vmatpush2.bf16.msra.mxu0 %v1701_v58  ;;  %v1787_v58 = vld [vmem:[#allocation5 + $0x168] ss:$16 sps:$4 sm:$0xff]  }
  0x6b   :  { %939 = vmatpush2.bf16.msra.mxu1 %v1702_v59  ;;  %899 = vmatprep.subr.bf16.mxu0 %v1703_v60  ;;  %v1790_v59 = vld [vmem:[#allocation5 + $0x368] ss:$16 sps:$4 sm:$0xff]   ;;  %v1795_v60 = vld [vmem:[#allocation5 + $0x14c] ss:$16 sps:$4 sm:$0xff]  }
  0x6c   :  { %940 = vmatprep.subr.bf16.mxu1 %v1705_v61  ;;  %v1798_v61 = vld [vmem:[#allocation5 + $0x34c] ss:$16 sps:$4 sm:$0xff]  }
  0x6e   :  { %900 = vmatpush2.bf16.msra.mxu0 %v1707_v62  ;;  %v1793_v62 = vld [vmem:[#allocation5 + $0x148] ss:$16 sps:$4 sm:$0xff]  }
  0x6f   :  { %941 = vmatpush2.bf16.msra.mxu1 %v1708_v63  ;;  %901 = vmatprep.subr.bf16.mxu0 %v1709_v0  ;;  %v1796_v63 = vld [vmem:[#allocation5 + $0x348] ss:$16 sps:$4 sm:$0xff]   ;;  %v1801_v0 = vld [vmem:[#allocation5 + $0x12c] ss:$16 sps:$4 sm:$0xff]  }
  0x70   :  { %942 = vmatprep.subr.bf16.mxu1 %v1711_v1  ;;  %v1804_v1 = vld [vmem:[#allocation5 + $0x32c] ss:$16 sps:$4 sm:$0xff]  }
  0x72   :  { %902 = vmatpush2.bf16.msra.mxu0 %v1713_v2  ;;  %v1799_v2 = vld [vmem:[#allocation5 + $0x128] ss:$16 sps:$4 sm:$0xff]  }
  0x73   :  { %943 = vmatpush2.bf16.msra.mxu1 %v1714_v3  ;;  %953 = vmatprep.subr.bf16.mxu0 %v1717_v6  ;;  %v1802_v3 = vld [vmem:[#allocation5 + $0x328] ss:$16 sps:$4 sm:$0xff]  }
  0x74   :  { %994 = vmatprep.subr.bf16.mxu1 %v1720_v7  ;;  %v1805_v6 = vld [vmem:[#allocation5 + $0x108] ss:$16 sps:$4 sm:$0xff]  }
  0x75   :  { %904 = vmatmul.mubr.bf16.vlgmr.msra.gmra.mxu0 %v2005_v8  ;;  %v1808_v7 = vld [vmem:[#allocation5 + $0x308] ss:$16 sps:$4 sm:$0xff]  }
  0x76   :  { %945 = vmatmul.mubr.bf16.vlgmr.msra.gmra.mxu1 %v2007_v9  ;;  %954 = vmatpush1.bf16.msra.mxu0 %v1715_v10  ;;  %v1811_v10 = vld [vmem:[#allocation8 + $0x78] sm:$0xff]  }
  0x77   :  { %995 = vmatpush1.bf16.msra.mxu1 %v1718_v11  ;;  %955 = vmatprep.subr.bf16.mxu0 %v1723_v12  ;;  %v1812_v11 = vld [vmem:[#allocation8 + $0x38] sm:$0xff]   ;;  %v1813_v12 = vld [vmem:[#allocation8 + $0x70] sm:$0xff]  }
  0x78   :  { %996 = vmatprep.subr.bf16.mxu1 %v1726_v13  ;;  %985 = vmatprep.mubr.bf16.mxu0 %v2002_v49  ;;  %v1780_v49 = vld [vmem:[#allocation5 + $0x3ac] ss:$16 sps:$4 sm:$0xff]   ;;  %v1814_v13 = vld [vmem:[#allocation8 + $0x30] sm:$0xff]  }
  0x79   :  { %1026 = vmatprep.mubr.bf16.mxu1 %v80_v52  ;;  %v1783_v52 = vld [vmem:[#allocation5 + $0x18c] ss:$16 sps:$4 sm:$0xff]  }
  0x7a   :  { %956 = vmatpush1.bf16.msra.mxu0 %v1721_v14  ;;  %v1815_v14 = vld [vmem:[#allocation8 + $0x68] sm:$0xff]  }
  0x7b   :  { %997 = vmatpush1.bf16.msra.mxu1 %v1724_v15  ;;  %957 = vmatprep.subr.bf16.mxu0 %v1729_v16  ;;  %v1816_v15 = vld [vmem:[#allocation8 + $0x28] sm:$0xff]   ;;  %v1817_v16 = vld [vmem:[#allocation8 + $0x60] sm:$0xff]  }
  0x7c   :  { %998 = vmatprep.subr.bf16.mxu1 %v1732_v17  ;;  %v1818_v17 = vld [vmem:[#allocation8 + $0x20] sm:$0xff]  }
  0x7e   :  { %958 = vmatpush1.bf16.msra.mxu0 %v1727_v18  ;;  %v1819_v18 = vld [vmem:[#allocation8 + $0x58] sm:$0xff]  }
  0x7f   :  { %999 = vmatpush1.bf16.msra.mxu1 %v1730_v19  ;;  %959 = vmatprep.subr.bf16.mxu0 %v1735_v20  ;;  %v1827_v19 = vld [vmem:[#allocation8 + $0xf8] sm:$0xff]  }
  0x80   :  { %1000 = vmatprep.subr.bf16.mxu1 %v1738_v21  ;;  %v1828_v20 = vld [vmem:[#allocation8 + $0xb8] sm:$0xff]   ;;  %v1829_v21 = vld [vmem:[#allocation8 + $0xf0] sm:$0xff]  }
  0x82   :  { %960 = vmatpush1.bf16.msra.mxu0 %v1733_v22  ;;  %v1820_v22 = vld [vmem:[#allocation8 + $0x18] sm:$0xff]  }
  0x83   :  { %1001 = vmatpush1.bf16.msra.mxu1 %v1736_v23  ;;  %961 = vmatprep.subr.bf16.mxu0 %v1741_v24  ;;  %v1831_v23 = vld [vmem:[#allocation8 + $0xe8] sm:$0xff]   ;;  %v1822_v24 = vld [vmem:[#allocation8 + $0x10] sm:$0xff]  }
  0x84   :  { %1002 = vmatprep.subr.bf16.mxu1 %v1744_v25  ;;  %v1823_v25 = vld [vmem:[#allocation8 + $0x48] sm:$0xff]  }
  0x86   :  { %962 = vmatpush1.bf16.msra.mxu0 %v1739_v26  ;;  %v1832_v26 = vld [vmem:[#allocation8 + $0xa8] sm:$0xff]  }
  0x87   :  { %1003 = vmatpush1.bf16.msra.mxu1 %v1742_v27  ;;  %963 = vmatprep.subr.bf16.mxu0 %v1747_v28  ;;  %v1833_v27 = vld [vmem:[#allocation8 + $0xe0] sm:$0xff]   ;;  %v1824_v28 = vld [vmem:[#allocation8 + $0x8] sm:$0xff]  }
  0x88   :  { %1004 = vmatprep.subr.bf16.mxu1 %v1750_v29  ;;  %v1825_v29 = vld [vmem:[#allocation8 + $0x40] sm:$0xff]  }
  0x8a   :  { %964 = vmatpush1.bf16.msra.mxu0 %v1745_v30  ;;  %v1834_v30 = vld [vmem:[#allocation8 + $0xa0] sm:$0xff]  }
  0x8b   :  { %1005 = vmatpush1.bf16.msra.mxu1 %v1748_v31  ;;  %965 = vmatprep.subr.bf16.mxu0 %v1753_v32  ;;  %v1835_v31 = vld [vmem:[#allocation8 + $0xd8] sm:$0xff]   ;;  %v1826_v32 = vld [vmem:[#allocation8] sm:$0xff]  }
  0x8c   :  { %1006 = vmatprep.subr.bf16.mxu1 %v1756_v33  ;;  %v1836_v33 = vld [vmem:[#allocation8 + $0x98] sm:$0xff]  }
  0x8e   :  { %966 = vmatpush1.bf16.msra.mxu0 %v1751_v34  ;;  %v1837_v34 = vld [vmem:[#allocation8 + $0xd0] sm:$0xff]  }
  0x8f   :  { %1007 = vmatpush1.bf16.msra.mxu1 %v1754_v35  ;;  %967 = vmatprep.subr.bf16.mxu0 %v1759_v36  ;;  %v1838_v35 = vld [vmem:[#allocation8 + $0x90] sm:$0xff]   ;;  %v1839_v36 = vld [vmem:[#allocation8 + $0xc8] sm:$0xff]  }
  0x90   :  { %1008 = vmatprep.subr.bf16.mxu1 %v1762_v37  ;;  %v1840_v37 = vld [vmem:[#allocation8 + $0x88] sm:$0xff]  }
  0x92   :  { %968 = vmatpush1.bf16.msra.mxu0 %v1757_v38  ;;  %v1841_v38 = vld [vmem:[#allocation8 + $0xc0] sm:$0xff]  }
  0x93   :  { %1009 = vmatpush1.bf16.msra.mxu1 %v1760_v39  ;;  %969 = vmatprep.subr.bf16.mxu0 %v1765_v40  ;;  %v1842_v39 = vld [vmem:[#allocation8 + $0x80] sm:$0xff]   ;;  %v211_v40 = vlaneseq }
  0x94   :  { %1010 = vmatprep.subr.bf16.mxu1 %v1768_v41 }
  0x95   :  { %v212_v41 = vshrl.u32 %v211_v40, 7 }
  0x96   :  { %970 = vmatpush2.bf16.msra.mxu0 %v1763_v42 }
  0x97   :  { %1011 = vmatpush2.bf16.msra.mxu1 %v1766_v43  ;;  %971 = vmatprep.subr.bf16.mxu0 %v1771_v44  ;;  %v213_v42 = vsub.s32 0, %v212_v41  ;;  %v209_v43 = vld [vmem:[#allocation7] sm:$0xf]  ;;  %v217_v44 = vsub.s32 1, %v212_v41 }
  0x98   :  { %1012 = vmatprep.subr.bf16.mxu1 %v1774_v45 }
  0x99   :  { %v214_v45 = vrot.slane %v209_v43, %v213_v42 }
  0x9a   :  { %972 = vmatpush2.bf16.msra.mxu0 %v1769_v46  ;;  %v218_v46 = vrot.slane %v209_v43, %v217_v44 }
  0x9b   :  { %1013 = vmatpush2.bf16.msra.mxu1 %v1772_v47  ;;  %973 = vmatprep.subr.bf16.mxu0 %v1777_v48 }
  0x9c   :  { %1014 = vmatprep.subr.bf16.mxu1 %v1780_v49 }
  0x9e   :  { %974 = vmatpush2.bf16.msra.mxu0 %v1775_v50 }
  0x9f   :  { %1015 = vmatpush2.bf16.msra.mxu1 %v1778_v51  ;;  %975 = vmatprep.subr.bf16.mxu0 %v1783_v52 }
  0xa0   :  { %1016 = vmatprep.subr.bf16.mxu1 %v1786_v53 }
  0xa2   :  { %976 = vmatpush2.bf16.msra.mxu0 %v1781_v54 }
  0xa3   :  { %1017 = vmatpush2.bf16.msra.mxu1 %v1784_v55  ;;  %977 = vmatprep.subr.bf16.mxu0 %v1789_v56 }
  0xa4   :  { %1018 = vmatprep.subr.bf16.mxu1 %v1792_v57 }
  0xa6   :  { %978 = vmatpush2.bf16.msra.mxu0 %v1787_v58 }
  0xa7   :  { %1019 = vmatpush2.bf16.msra.mxu1 %v1790_v59  ;;  %979 = vmatprep.subr.bf16.mxu0 %v1795_v60 }
  0xa8   :  { %1020 = vmatprep.subr.bf16.mxu1 %v1798_v61 }
  0xaa   :  { %980 = vmatpush2.bf16.msra.mxu0 %v1793_v62 }
  0xab   :  { %1021 = vmatpush2.bf16.msra.mxu1 %v1796_v63  ;;  %981 = vmatprep.subr.bf16.mxu0 %v1801_v0  ;;  %v221_v63 = vsub.s32 2, %v212_v41  ;;  %v225_v0 = vsub.s32 3, %v212_v41 }
  0xac   :  { %1022 = vmatprep.subr.bf16.mxu1 %v1804_v1 }
  0xad   :  { %v222_v1 = vrot.slane %v209_v43, %v221_v63 }
  0xae   :  { %982 = vmatpush2.bf16.msra.mxu0 %v1799_v2  ;;  %v226_v2 = vrot.slane %v209_v43, %v225_v0 }
  0xaf   :  { %1023 = vmatpush2.bf16.msra.mxu1 %v1802_v3  ;;  %983 = vmatprep.subr.bf16.mxu0 %v1807_v4 }
  0xb0   :  { %1024 = vmatprep.subr.bf16.mxu1 %v1810_v5 }
  0xb2   :  { %984 = vmatpush2.bf16.msra.mxu0 %v1805_v6 }
  0xb3   :  { %1025 = vmatpush2.bf16.msra.mxu1 %v1808_v7  ;;  %1566 = vmatprep.subr.bf16.mxu0 %v1811_v10 }
  0xb4   :  { %1588 = vmatprep.subr.bf16.mxu1 %v1827_v19 }
  0xb5   :  { %986 = vmatmul.mubr.bf16.vlgmr.msra.gmra.mxu0 %v2005_v8  ;;  %v1821_v8 = vld [vmem:[#allocation8 + $0x50] sm:$0xff]  }
  0xb6   :  { %1027 = vmatmul.mubr.bf16.vlgmr.msra.gmra.mxu1 %v2007_v9  ;;  %1567 = vmatpush3.bf16.msra.mxu0 %v1812_v11  ;;  %v1830_v9 = vld [vmem:[#allocation8 + $0xb0] sm:$0xff]  }
  0xb7   :  { %1568 = vmatprep.subr.bf16.mxu0 %v1813_v12  ;;  %1589 = vmatpush3.bf16.msra.mxu1 %v1828_v20 }
  0xb8   :  { %1590 = vmatprep.subr.bf16.mxu1 %v1829_v21 }
  0xba   :  { %1569 = vmatpush3.bf16.msra.mxu0 %v1814_v13 }
  0xbb   :  { %1570 = vmatprep.subr.bf16.mxu0 %v1815_v14  ;;  %1591 = vmatpush3.bf16.msra.mxu1 %v1830_v9 }
  0xbc   :  { %1592 = vmatprep.subr.bf16.mxu1 %v1831_v23 }
  0xbe   :  { %1571 = vmatpush3.bf16.msra.mxu0 %v1816_v15 }
  0xbf   :  { %1572 = vmatprep.subr.bf16.mxu0 %v1817_v16  ;;  %1593 = vmatpush3.bf16.msra.mxu1 %v1832_v26 }
  0xc0   :  { %1594 = vmatprep.subr.bf16.mxu1 %v1833_v27 }
  0xc2   :  { %1573 = vmatpush3.bf16.msra.mxu0 %v1818_v17 }
  0xc3   :  { %1574 = vmatprep.subr.bf16.mxu0 %v1819_v18  ;;  %1595 = vmatpush3.bf16.msra.mxu1 %v1834_v30 }
  0xc4   :  { %1596 = vmatprep.subr.bf16.mxu1 %v1835_v31 }
  0xc6   :  { %1575 = vmatpush3.bf16.msra.mxu0 %v1820_v22 }
  0xc7   :  { %1576 = vmatprep.subr.bf16.mxu0 %v1821_v8  ;;  %1597 = vmatpush3.bf16.msra.mxu1 %v1836_v33 }
  0xc8   :  { %1598 = vmatprep.subr.bf16.mxu1 %v1837_v34 }
  0xca   :  { %1577 = vmatpush3.bf16.msra.mxu0 %v1822_v24  ;;  %v1533_v24 = vld [vmem:[%s2024_s4] ss:$0 sm:$0xff] }
  0xcb   :  { %1578 = vmatprep.subr.bf16.mxu0 %v1823_v25  ;;  %1599 = vmatpush3.bf16.msra.mxu1 %v1838_v35 }
  0xcc   :  { %1600 = vmatprep.subr.bf16.mxu1 %v1839_v36 }
  0xce   :  { %1579 = vmatpush3.bf16.msra.mxu0 %v1824_v28 }
  0xcf   :  { %1580 = vmatprep.subr.bf16.mxu0 %v1825_v29  ;;  %1601 = vmatpush3.bf16.msra.mxu1 %v1840_v37 }
  0xd0   :  { %1602 = vmatprep.subr.bf16.mxu1 %v1841_v38 }
  0xd2   :  { %1581 = vmatpush3.bf16.msra.mxu0 %v1826_v32 }
  0xd3   :  { %1603 = vmatpush3.bf16.msra.mxu1 %v1842_v39 }
 0x135   :  { %v905_v47 = vpop.f32.mrf.mxu0 }
 0x136   :  { %v946_v48 = vpop.f32.mrf.mxu1  ;;  %v906_v49 = vadd.f32 %v905_v47, %v214_v45 }
 0x137   :  { %v907_v50 = vpop.f32.mrf.mxu0 }
 0x138   :  { %v948_v51 = vpop.f32.mrf.mxu1  ;;  %v947_v52 = vadd.f32 %v946_v48, %v906_v49  ;;  %v908_v53 = vadd.f32 %v907_v50, %v218_v46 }
 0x139   :  { %v909_v54 = vpop.f32.mrf.mxu0 }
 0x13a   :  { %v950_v55 = vpop.f32.mrf.mxu1  ;;  %v949_v56 = vadd.f32 %v948_v51, %v908_v53  ;;  %v1035_v57 = vmax.f32 %v947_v52, 0.0 }
 0x13b   :  { %v910_v58 = vpop.f32.mrf.mxu0 }
 0x13c   :  { %v951_v59 = vpop.f32.mrf.mxu1  ;;  %v1036_v60 = vmax.f32 %v949_v56, 0.0  ;;  %v1039_v62 = vpack.c.bf16 %v1035_v57, %v1035_v57 }
 0x13e   :  { %v1040_v61 = vpack.c.bf16 %v1036_v60, %v1036_v60 }
 0x140   :  { %1338 = vmatprep.mubr.bf16.mxu0 %v1040_v61 }
 0x141   :  { %1339 = vmatmul.mubr.bf16.vlgmr.msra.gmra.mxu0 %v1039_v62 }
 0x175   :  { %v987_v3 = vpop.f32.mrf.mxu0 }
 0x176   :  { %v1028_v4 = vpop.f32.mrf.mxu1  ;;  %v988_v5 = vadd.f32 %v987_v3, %v222_v1 }
 0x177   :  { %v989_v6 = vpop.f32.mrf.mxu0 }
 0x178   :  { %v1030_v7 = vpop.f32.mrf.mxu1  ;;  %v1029_v10 = vadd.f32 %v1028_v4, %v988_v5  ;;  %v990_v11 = vadd.f32 %v989_v6, %v226_v2 }
 0x179   :  { %v991_v12 = vpop.f32.mrf.mxu0 }
 0x17a   :  { %v1032_v13 = vpop.f32.mrf.mxu1  ;;  %v1031_v14 = vadd.f32 %v1030_v7, %v990_v11  ;;  %v1037_v15 = vmax.f32 %v1029_v10, 0.0 }
 0x17b   :  { %v992_v16 = vpop.f32.mrf.mxu0 }
 0x17c   :  { %v1033_v17 = vpop.f32.mrf.mxu1  ;;  %v1038_v18 = vmax.f32 %v1031_v14, 0.0  ;;  %v1041_v20 = vpack.c.bf16 %v1037_v15, %v1037_v15 }
 0x17e   :  { %v1042_v19 = vpack.c.bf16 %v1038_v18, %v1038_v18 }
 0x180   :  { %1378 = vmatprep.mubr.bf16.mxu1 %v1042_v19 }
 0x181   :  { %1379 = vmatmul.mubr.bf16.vlgmr.msra.gmra.mxu1 %v1041_v20 }
 0x201   :  { %v1582_v21 = vpop.f32.mrf.mxu0 }
 0x203   :  { %v1583_v22 = vpop.f32.mrf.mxu0 }
 0x204   :  { %v1584_v23 = vadd.f32 %v1583_v22, %v1582_v21 }
 0x205   :  { %v1585_v8 = vpop.f32.mrf.mxu0 }
 0x206   :  { %v1341_v27 = vadd.f32 %v1584_v23, %v1533_v24 }
 0x207   :  { %v1586_v9 = vpop.f32.mrf.mxu0 }
 0x241   :  { %v1604_v25 = vpop.f32.mrf.mxu1 }
 0x243   :  { %v1605_v26 = vpop.f32.mrf.mxu1 }
 0x244   :  { %v1606_v28 = vadd.f32 %v1605_v26, %v1604_v25 }
 0x245   :  { %v1607_v29 = vpop.f32.mrf.mxu1 }
 0x246   :  { %v1381_v30 = vadd.f32 %v1606_v28, %v1341_v27 }
 0x247   :  { %v1608_v31 = vpop.f32.mrf.mxu1 }
 0x248   :  { %1387 = vst.msk [vmem:[#allocation10] sm:$0xff] %vm1386_vm0, %v1381_v30 }
 0x249   :  { %1934 = shalt.err (!%p1931_p10)
}
 0x24a   :  { %1397 = dma.vmem_to_hbm [thread:$0]  %s1395_s16, 128, %s2025_s5, [#allocation4]  }
 0x24b   :  { %1949 = dma.done.wait [#allocation4], 128  }
 0x24c   :  { %1950 = vsyncadd [#allocation4], 4294967168 }
 0x24d   :  { %1401 = vsyncpa [#allocation3], 1 }
 0x24e   :  { %1402 = vsyncpa [#allocation6], 1 }
 0x24f   :  { %1403 = vsyncpa [#allocation9], 1 }
 0x250   :  { %1404 = vsyncpa [#allocation4], 1 }

</bundles_post_ra>
